<compile_context>
chip_gen: v6e
topology: v6e:2x2x1
jax: 0.10.0
libtpu: 0.0.40
codegen_flags: <defaults>
</compile_context>

<pallas_src>
import functools

import jax
import jax.numpy as jnp
from jax.experimental import pallas as pl
from jax.experimental.pallas import tpu as pltpu  # noqa: F401  (not needed for a grid-less VMEM-resident call)


# ------------------------------ fused kernel ------------------------------- #

def _sig_encoder_kernel(a_ref, x_ref, epsu_ref, nrm_ref, *refs,
                        n_nodes, n_samples, k_split,
                        num_u, num_mu, num_sigma, gin_eps):
    """Fused SIGEncoder forward for the whole (K+J)-sample batch.

    Ref layout:
      a_ref     : (N, N)              dense adjacency (shared by all samples)
      x_ref     : (B*N, Fin)          node features broadcast over the batch
      epsu_ref  : (Lu, B*N, noise)    per-GNNu-layer Bernoulli(0.5) noise
      nrm_ref   : (J*N, D)            N(0,1) noise for the reparameterization
      refs[:-3] : split GIN Linear weights + (1, F_out) biases
      refs[-3:] : outputs  mu (B*N, Dmu), logvar (B*N, Ds), z (J*N, Dmu)
    """
    w_refs = refs[:-3]
    mu_ref, logvar_ref, z_ref = refs[-3:]

    a = a_ref[...]
    x = x_ref[...]

    idx = [0]

    def nxt():                       # next weight/bias (consumed in fixed order)
        r = w_refs[idx[0]]
        idx[0] += 1
        return r[...]

    def propagate(xw):
        # GIN message passing, reassociated:
        #   ((1+e)*inp + A@inp) @ W == (1+e)*(inp@W) + A@(inp@W)
        # A is applied per sample block of rows (rows are (sample, node)-major).
        # TODO(synk): for large B, batch the feature axis (A @ (N, B*F)) instead.
        blocks = [jnp.dot(a, xw[s * n_nodes:(s + 1) * n_nodes, :],
                          preferred_element_type=jnp.float32)
                  for s in range(n_samples)]
        agg = jnp.concatenate(blocks, axis=0) if n_samples > 1 else blocks[0]
        return agg + (1.0 + gin_eps) * xw

    # ---- GNNu: noisy GIN stack.  NOTE (matches torch reference): the value
    # fed to the next layer is the PRE-activation hidden; ReLU is applied only
    # to the final layer's output.
    hidden = None
    for li in range(num_u):
        w_x = nxt()
        w_e = nxt()
        xw = (jnp.dot(x, w_x, preferred_element_type=jnp.float32)
              + jnp.dot(epsu_ref[li], w_e, preferred_element_type=jnp.float32))
        if li > 0:
            w_h = nxt()
            xw = xw + jnp.dot(hidden, w_h, preferred_element_type=jnp.float32)
        bias = nxt()
        hidden = propagate(xw) + bias
    h_l = jnp.maximum(hidden, 0.0)        # GNNu output = relu(last hidden)

    # ---- GNNmu / GNNsigma: noise_dim == 0, no activation.  The first layer
    # sees cat(X, hL) -> implemented as split-weight matmuls (no concat).
    def head(num_layers):
        h = None
        for li in range(num_layers):
            if li == 0:
                w_x = nxt()
                w_h = nxt()
                xw = (jnp.dot(x, w_x, preferred_element_type=jnp.float32)
                      + jnp.dot(h_l, w_h, preferred_element_type=jnp.float32))
            else:
                w = nxt()
                xw = jnp.dot(h, w, preferred_element_type=jnp.float32)
            bias = nxt()
            h = propagate(xw) + bias
        return h

    mu = head(num_mu)
    logvar = head(num_sigma)

    # ---- reparameterize the last J samples:  z = eps * exp(logvar/2) + mu
    row0 = k_split * n_nodes
    z = nrm_ref[...] * jnp.exp(logvar[row0:, :] * 0.5) + mu[row0:, :]

    mu_ref[...] = mu.astype(mu_ref.dtype)
    logvar_ref[...] = logvar.astype(logvar_ref.dtype)
    z_ref[...] = z.astype(z_ref.dtype)


# ------------------------------ host-side glue ------------------------------ #

def _split_params(params, fin, noise_dim):
    """Split each GIN Linear weight row-wise so the kernel never concatenates.

    cat(X, eps, h) @ W == X @ W[:fin] + eps @ W[fin:fin+nd] + h @ W[fin+nd:].
    Biases are passed as (1, F_out).  Order must match the kernel's consumption.
    """
    args = []
    for i, (W, b) in enumerate(params['u']):
        args.append(W[:fin])
        args.append(W[fin:fin + noise_dim])
        if i > 0:
            args.append(W[fin + noise_dim:])
        args.append(b.reshape(1, -1))
    for head in ('mu', 'sigma'):
        for i, (W, b) in enumerate(params[head]):
            if i == 0:
                args.append(W[:fin])
                args.append(W[fin:])
            else:
                args.append(W)
            args.append(b.reshape(1, -1))
    return args


def sig_encoder_apply(A, X, params, eps_u, eps_n, *, K, gin_eps=0.0):
    """Fused SIGEncoder forward given pre-sampled noise.

    A     : (N, N) dense adjacency (stand-in for the torch sparse COO matrix)
    X     : (1, N, Fin) node features
    eps_u : (Lu, K+J, N, noise_dim) Bernoulli(0.5) noise, one slab per GNNu layer
    eps_n : (J, N, D) standard-normal noise for the reparameterization
    returns (z, mu, logvar)
    """
    lu, b_total, n, noise_dim = eps_u.shape
    fin = X.shape[2]
    j = b_total - K
    d_mu = params['mu'][-1][0].shape[1]
    d_sigma = params['sigma'][-1][0].shape[1]
    assert d_mu == d_sigma, 'mu / sigma output dims must match for reparameterize'

    x_flat = jnp.broadcast_to(X.astype(jnp.float32),
                              (b_total, n, fin)).reshape(b_total * n, fin)
    eps_u_flat = eps_u.astype(jnp.float32).reshape(lu, b_total * n, noise_dim)
    eps_n_flat = eps_n.astype(jnp.float32).reshape(j * n, d_mu)
    w_args = _split_params(params, fin, noise_dim)

    kernel = functools.partial(
        _sig_encoder_kernel,
        n_nodes=n, n_samples=b_total, k_split=K,
        num_u=len(params['u']), num_mu=len(params['mu']),
        num_sigma=len(params['sigma']), gin_eps=gin_eps)

    mu_f, logvar_f, z_f = pl.pallas_call(
        kernel,
        out_shape=(
            jax.ShapeDtypeStruct((b_total * n, d_mu), jnp.float32),
            jax.ShapeDtypeStruct((b_total * n, d_sigma), jnp.float32),
            jax.ShapeDtypeStruct((j * n, d_mu), jnp.float32),
        ),
    )(A.astype(jnp.float32), x_flat, eps_u_flat, eps_n_flat, *w_args)

    return (z_f.reshape(j, n, d_mu),
            mu_f.reshape(b_total, n, d_mu),
            logvar_f.reshape(b_total, n, d_sigma))


def sig_encoder_forward(A, X, params, *, noise_dim, K, J, key, gin_eps=0.0):
    """Mirrors SIGEncoder.forward: samples noise, returns (z, eps, mu, logvar)."""
    n = X.shape[1]
    b_total = K + J
    lu = len(params['u'])
    d_out = params['sigma'][-1][0].shape[1]
    k_b, k_n = jax.random.split(key)
    eps_u = jax.random.bernoulli(k_b, 0.5, (lu, b_total, n, noise_dim)
                                 ).astype(jnp.float32)
    eps_n = jax.random.normal(k_n, (J, n, d_out), dtype=jnp.float32)
    z, mu, logvar = sig_encoder_apply(A, X, params, eps_u, eps_n,
                                      K=K, gin_eps=gin_eps)
    return z, eps_n, mu, logvar


# ------------------------ pure-JAX reference (checks) ----------------------- #

def _gin_layer_ref(A, x, W, b, gin_eps):
    h = (1.0 + gin_eps) * x + jnp.einsum('nm,bmf->bnf', A, x)
    return h @ W + b


def sig_encoder_reference(A, X, params, eps_u, eps_n, *, K, gin_eps=0.0):
    """Direct transcription of SIGEncoder.forward (dense A, same noise)."""
    _, b_total, n, _ = eps_u.shape
    x_e = jnp.broadcast_to(X, (b_total, n, X.shape[2]))
    hidden = None
    for li, (W, b) in enumerate(params['u']):
        if hidden is None:
            inp = jnp.concatenate([x_e, eps_u[li]], axis=2)
        else:
            inp = jnp.concatenate([x_e, eps_u[li], hidden], axis=2)
        hidden = _gin_layer_ref(A, inp, W, b, gin_eps)      # pre-activation fed on
    h_l = jax.nn.relu(hidden)                               # returned output

    inp0 = jnp.concatenate([x_e, h_l], axis=2)
    h = inp0
    for (W, b) in params['mu']:
        h = _gin_layer_ref(A, h, W, b, gin_eps)
    mu = h
    h = inp0
    for (W, b) in params['sigma']:
        h = _gin_layer_ref(A, h, W, b, gin_eps)
    logvar = h

    z = eps_n * jnp.exp(logvar[K:] * 0.5) + mu[K:]
    return z, mu, logvar


# ------------------------------ parameter init ------------------------------ #

def _init_linear(key, fin, fout):
    kw, kb = jax.random.split(key)
    scale = 1.0 / jnp.sqrt(jnp.float32(fin))
    W = jax.random.uniform(kw, (fin, fout), minval=-scale, maxval=scale,
                           dtype=jnp.float32)
    b = jax.random.uniform(kb, (fout,), minval=-scale, maxval=scale,
                           dtype=jnp.float32)
    return W, b


def init_sig_encoder_params(key, input_dim, output_dims_u, output_dims_mu,
                            output_dims_sigma, noise_dim):
    params = {'u': [], 'mu': [], 'sigma': []}
    hidden_dims = [0] + list(output_dims_u)
    for i in range(len(output_dims_u)):
        key, sub = jax.random.split(key)
        params['u'].append(
            _init_linear(sub, input_dim + noise_dim + hidden_dims[i],
                         hidden_dims[i + 1]))
    in0 = input_dim + output_dims_u[-1]
    dims_mu = [in0] + list(output_dims_mu)
    for i in range(len(output_dims_mu)):
        key, sub = jax.random.split(key)
        params['mu'].append(_init_linear(sub, dims_mu[i], dims_mu[i + 1]))
    dims_sig = [in0] + list(output_dims_sigma)
    for i in range(len(output_dims_sigma)):
        key, sub = jax.random.split(key)
        params['sigma'].append(_init_linear(sub, dims_sig[i], dims_sig[i + 1]))
    return params


# ---------------------------------- main ------------------------------------ #

if __name__ == "__main__":
    key = jax.random.PRNGKey(0)

    # small, forward-consistent shapes
    N = 8
    input_dim = 4
    noise_dim = 8
    output_dims_u = [16, 16]
    output_dims_mu = [8]
    output_dims_sigma = [8]
    K, J = 1, 1
    B = K + J

    k_a, k_x, k_p, k_eps, k_nrm = jax.random.split(key, 5)

    # symmetric 0/1 adjacency, no self loops (dense stand-in for sparse COO A)
    upper = (jax.random.uniform(k_a, (N, N)) < 0.4).astype(jnp.float32)
    A = jnp.triu(upper, k=1)
    A = A + A.T

    # node features [1, node, feature] — same convention as the torch module
    X = jax.random.normal(k_x, (1, N, input_dim), dtype=jnp.float32)

    params = init_sig_encoder_params(
        k_p, input_dim, output_dims_u, output_dims_mu, output_dims_sigma,
        noise_dim)

    # pre-sampled noise (Bernoulli per GNNu layer, Normal for reparam) so the
    # fused kernel and the pure-JAX reference see identical randomness
    Lu = len(output_dims_u)
    eps_u = jax.random.bernoulli(k_eps, 0.5, (Lu, B, N, noise_dim)
                                 ).astype(jnp.float32)
    eps_n = jax.random.normal(k_nrm, (J, N, output_dims_mu[-1]),
                              dtype=jnp.float32)

    fused = jax.jit(functools.partial(sig_encoder_apply, K=K))
    z, mu, logvar = fused(A, X, params, eps_u, eps_n)
    jax.block_until_ready((z, mu, logvar))
    eps = eps_n  # the module returns the reparameterization noise as well

    # shape checks mirroring SIGEncoder.forward
    assert mu.shape == (B, N, output_dims_mu[-1])
    assert logvar.shape == (B, N, output_dims_sigma[-1])
    assert z.shape == (J, N, output_dims_mu[-1])
    assert eps.shape == (J, N, output_dims_sigma[-1])

    # numerical check against a pure-JAX transcription of the torch forward
    z_r, mu_r, lv_r = sig_encoder_reference(A, X, params, eps_u, eps_n, K=K)
    for got, want in ((mu, mu_r), (logvar, lv_r), (z, z_r)):
        assert bool(jnp.all(jnp.isfinite(got)))
        assert bool(jnp.allclose(got, want, rtol=5e-2, atol=5e-2)), \
            float(jnp.max(jnp.abs(got - want)))

    print("KERNEL_OK")
</pallas_src>

<mosaic_0001>
module attributes {stable_mosaic.version = 11 : i64} {
  func.func @_sig_encoder_kernel(%arg0: memref<8x8xf32, #tpu.memory_space<vmem>>, %arg1: memref<16x4xf32, #tpu.memory_space<vmem>>, %arg2: memref<2x16x8xf32, #tpu.memory_space<vmem>>, %arg3: memref<8x8xf32, #tpu.memory_space<vmem>>, %arg4: memref<4x16xf32, #tpu.memory_space<vmem>>, %arg5: memref<8x16xf32, #tpu.memory_space<vmem>>, %arg6: memref<1x16xf32, #tpu.memory_space<vmem>>, %arg7: memref<4x16xf32, #tpu.memory_space<vmem>>, %arg8: memref<8x16xf32, #tpu.memory_space<vmem>>, %arg9: memref<16x16xf32, #tpu.memory_space<vmem>>, %arg10: memref<1x16xf32, #tpu.memory_space<vmem>>, %arg11: memref<4x8xf32, #tpu.memory_space<vmem>>, %arg12: memref<16x8xf32, #tpu.memory_space<vmem>>, %arg13: memref<1x8xf32, #tpu.memory_space<vmem>>, %arg14: memref<4x8xf32, #tpu.memory_space<vmem>>, %arg15: memref<16x8xf32, #tpu.memory_space<vmem>>, %arg16: memref<1x8xf32, #tpu.memory_space<vmem>>, %arg17: memref<16x8xf32, #tpu.memory_space<vmem>>, %arg18: memref<16x8xf32, #tpu.memory_space<vmem>>, %arg19: memref<8x8xf32, #tpu.memory_space<vmem>>) attributes {dimension_semantics = [], scalar_prefetch = 0 : i64, scratch_operands = 0 : i64, tpu.core_type = #tpu.core_type<tc>} {
    %c0 = arith.constant 0 : index
    %c0_0 = arith.constant 0 : index
    %0 = vector.load %arg0[%c0, %c0_0] : memref<8x8xf32, #tpu.memory_space<vmem>>, vector<8x8xf32>
    %c0_1 = arith.constant 0 : index
    %c0_2 = arith.constant 0 : index
    %1 = vector.load %arg1[%c0_1, %c0_2] : memref<16x4xf32, #tpu.memory_space<vmem>>, vector<16x4xf32>
    %c0_3 = arith.constant 0 : index
    %c0_4 = arith.constant 0 : index
    %2 = vector.load %arg4[%c0_3, %c0_4] : memref<4x16xf32, #tpu.memory_space<vmem>>, vector<4x16xf32>
    %c0_5 = arith.constant 0 : index
    %c0_6 = arith.constant 0 : index
    %3 = vector.load %arg5[%c0_5, %c0_6] : memref<8x16xf32, #tpu.memory_space<vmem>>, vector<8x16xf32>
    %cst = arith.constant dense<0.000000e+00> : vector<16x16xf32>
    %4 = tpu.matmul %1, %2, %cst {dimension_numbers = #tpu.dot_dimension_numbers<[1], [0], [0], [1], [0, 0, 1, 1], [], []>} : vector<16x4xf32>, vector<4x16xf32>, vector<16x16xf32> -> vector<16x16xf32>
    %c0_7 = arith.constant 0 : index
    %c0_8 = arith.constant 0 : index
    %c0_9 = arith.constant 0 : index
    %5 = vector.load %arg2[%c0_7, %c0_8, %c0_9] : memref<2x16x8xf32, #tpu.memory_space<vmem>>, vector<1x16x8xf32>
    %6 = vector.shape_cast %5 : vector<1x16x8xf32> to vector<16x8xf32>
    %cst_10 = arith.constant dense<0.000000e+00> : vector<16x16xf32>
    %7 = tpu.matmul %6, %3, %cst_10 {dimension_numbers = #tpu.dot_dimension_numbers<[1], [0], [0], [1], [0, 0, 1, 1], [], []>} : vector<16x8xf32>, vector<8x16xf32>, vector<16x16xf32> -> vector<16x16xf32>
    %8 = arith.addf %4, %7 : vector<16x16xf32>
    %c0_11 = arith.constant 0 : index
    %c0_12 = arith.constant 0 : index
    %9 = vector.load %arg6[%c0_11, %c0_12] : memref<1x16xf32, #tpu.memory_space<vmem>>, vector<1x16xf32>
    %10 = vector.extract_strided_slice %8 {offsets = [0, 0], sizes = [8, 16], strides = [1, 1]} : vector<16x16xf32> to vector<8x16xf32>
    %cst_13 = arith.constant dense<0.000000e+00> : vector<8x16xf32>
    %11 = tpu.matmul %0, %10, %cst_13 {dimension_numbers = #tpu.dot_dimension_numbers<[1], [0], [0], [1], [0, 0, 1, 1], [], []>} : vector<8x8xf32>, vector<8x16xf32>, vector<8x16xf32> -> vector<8x16xf32>
    %12 = vector.extract_strided_slice %8 {offsets = [8, 0], sizes = [8, 16], strides = [1, 1]} : vector<16x16xf32> to vector<8x16xf32>
    %cst_14 = arith.constant dense<0.000000e+00> : vector<8x16xf32>
    %13 = tpu.matmul %0, %12, %cst_14 {dimension_numbers = #tpu.dot_dimension_numbers<[1], [0], [0], [1], [0, 0, 1, 1], [], []>} : vector<8x8xf32>, vector<8x16xf32>, vector<8x16xf32> -> vector<8x16xf32>
    %14 = tpu.concatenate %11, %13 in 0 : vector<8x16xf32>, vector<8x16xf32> -> vector<16x16xf32>
    %cst_15 = arith.constant 1.000000e+00 : f32
    %15 = vector.broadcast %cst_15 : f32 to vector<16x16xf32>
    %16 = arith.mulf %15, %8 : vector<16x16xf32>
    %17 = arith.addf %14, %16 : vector<16x16xf32>
    %18 = vector.broadcast %9 : vector<1x16xf32> to vector<16x16xf32>
    %19 = arith.addf %17, %18 : vector<16x16xf32>
    %c0_16 = arith.constant 0 : index
    %c0_17 = arith.constant 0 : index
    %20 = vector.load %arg7[%c0_16, %c0_17] : memref<4x16xf32, #tpu.memory_space<vmem>>, vector<4x16xf32>
    %c0_18 = arith.constant 0 : index
    %c0_19 = arith.constant 0 : index
    %21 = vector.load %arg8[%c0_18, %c0_19] : memref<8x16xf32, #tpu.memory_space<vmem>>, vector<8x16xf32>
    %cst_20 = arith.constant dense<0.000000e+00> : vector<16x16xf32>
    %22 = tpu.matmul %1, %20, %cst_20 {dimension_numbers = #tpu.dot_dimension_numbers<[1], [0], [0], [1], [0, 0, 1, 1], [], []>} : vector<16x4xf32>, vector<4x16xf32>, vector<16x16xf32> -> vector<16x16xf32>
    %c1 = arith.constant 1 : index
    %c0_21 = arith.constant 0 : index
    %c0_22 = arith.constant 0 : index
    %23 = vector.load %arg2[%c1, %c0_21, %c0_22] : memref<2x16x8xf32, #tpu.memory_space<vmem>>, vector<1x16x8xf32>
    %24 = vector.shape_cast %23 : vector<1x16x8xf32> to vector<16x8xf32>
    %cst_23 = arith.constant dense<0.000000e+00> : vector<16x16xf32>
    %25 = tpu.matmul %24, %21, %cst_23 {dimension_numbers = #tpu.dot_dimension_numbers<[1], [0], [0], [1], [0, 0, 1, 1], [], []>} : vector<16x8xf32>, vector<8x16xf32>, vector<16x16xf32> -> vector<16x16xf32>
    %26 = arith.addf %22, %25 : vector<16x16xf32>
    %c0_24 = arith.constant 0 : index
    %c0_25 = arith.constant 0 : index
    %27 = vector.load %arg9[%c0_24, %c0_25] : memref<16x16xf32, #tpu.memory_space<vmem>>, vector<16x16xf32>
    %cst_26 = arith.constant dense<0.000000e+00> : vector<16x16xf32>
    %28 = tpu.matmul %19, %27, %cst_26 {dimension_numbers = #tpu.dot_dimension_numbers<[1], [0], [0], [1], [0, 0, 1, 1], [], []>} : vector<16x16xf32>, vector<16x16xf32>, vector<16x16xf32> -> vector<16x16xf32>
    %29 = arith.addf %26, %28 : vector<16x16xf32>
    %c0_27 = arith.constant 0 : index
    %c0_28 = arith.constant 0 : index
    %30 = vector.load %arg10[%c0_27, %c0_28] : memref<1x16xf32, #tpu.memory_space<vmem>>, vector<1x16xf32>
    %31 = vector.extract_strided_slice %29 {offsets = [0, 0], sizes = [8, 16], strides = [1, 1]} : vector<16x16xf32> to vector<8x16xf32>
    %cst_29 = arith.constant dense<0.000000e+00> : vector<8x16xf32>
    %32 = tpu.matmul %0, %31, %cst_29 {dimension_numbers = #tpu.dot_dimension_numbers<[1], [0], [0], [1], [0, 0, 1, 1], [], []>} : vector<8x8xf32>, vector<8x16xf32>, vector<8x16xf32> -> vector<8x16xf32>
    %33 = vector.extract_strided_slice %29 {offsets = [8, 0], sizes = [8, 16], strides = [1, 1]} : vector<16x16xf32> to vector<8x16xf32>
    %cst_30 = arith.constant dense<0.000000e+00> : vector<8x16xf32>
    %34 = tpu.matmul %0, %33, %cst_30 {dimension_numbers = #tpu.dot_dimension_numbers<[1], [0], [0], [1], [0, 0, 1, 1], [], []>} : vector<8x8xf32>, vector<8x16xf32>, vector<8x16xf32> -> vector<8x16xf32>
    %35 = tpu.concatenate %32, %34 in 0 : vector<8x16xf32>, vector<8x16xf32> -> vector<16x16xf32>
    %cst_31 = arith.constant 1.000000e+00 : f32
    %36 = vector.broadcast %cst_31 : f32 to vector<16x16xf32>
    %37 = arith.mulf %36, %29 : vector<16x16xf32>
    %38 = arith.addf %35, %37 : vector<16x16xf32>
    %39 = vector.broadcast %30 : vector<1x16xf32> to vector<16x16xf32>
    %40 = arith.addf %38, %39 : vector<16x16xf32>
    %cst_32 = arith.constant 0.000000e+00 : f32
    %41 = vector.broadcast %cst_32 : f32 to vector<16x16xf32>
    %42 = arith.maximumf %40, %41 : vector<16x16xf32>
    %c0_33 = arith.constant 0 : index
    %c0_34 = arith.constant 0 : index
    %43 = vector.load %arg11[%c0_33, %c0_34] : memref<4x8xf32, #tpu.memory_space<vmem>>, vector<4x8xf32>
    %c0_35 = arith.constant 0 : index
    %c0_36 = arith.constant 0 : index
    %44 = vector.load %arg12[%c0_35, %c0_36] : memref<16x8xf32, #tpu.memory_space<vmem>>, vector<16x8xf32>
    %cst_37 = arith.constant dense<0.000000e+00> : vector<16x8xf32>
    %45 = tpu.matmul %1, %43, %cst_37 {dimension_numbers = #tpu.dot_dimension_numbers<[1], [0], [0], [1], [0, 0, 1, 1], [], []>} : vector<16x4xf32>, vector<4x8xf32>, vector<16x8xf32> -> vector<16x8xf32>
    %cst_38 = arith.constant dense<0.000000e+00> : vector<16x8xf32>
    %46 = tpu.matmul %42, %44, %cst_38 {dimension_numbers = #tpu.dot_dimension_numbers<[1], [0], [0], [1], [0, 0, 1, 1], [], []>} : vector<16x16xf32>, vector<16x8xf32>, vector<16x8xf32> -> vector<16x8xf32>
    %47 = arith.addf %45, %46 : vector<16x8xf32>
    %c0_39 = arith.constant 0 : index
    %c0_40 = arith.constant 0 : index
    %48 = vector.load %arg13[%c0_39, %c0_40] : memref<1x8xf32, #tpu.memory_space<vmem>>, vector<1x8xf32>
    %49 = vector.extract_strided_slice %47 {offsets = [0, 0], sizes = [8, 8], strides = [1, 1]} : vector<16x8xf32> to vector<8x8xf32>
    %cst_41 = arith.constant dense<0.000000e+00> : vector<8x8xf32>
    %50 = tpu.matmul %0, %49, %cst_41 {dimension_numbers = #tpu.dot_dimension_numbers<[1], [0], [0], [1], [0, 0, 1, 1], [], []>} : vector<8x8xf32>, vector<8x8xf32>, vector<8x8xf32> -> vector<8x8xf32>
    %51 = vector.extract_strided_slice %47 {offsets = [8, 0], sizes = [8, 8], strides = [1, 1]} : vector<16x8xf32> to vector<8x8xf32>
    %cst_42 = arith.constant dense<0.000000e+00> : vector<8x8xf32>
    %52 = tpu.matmul %0, %51, %cst_42 {dimension_numbers = #tpu.dot_dimension_numbers<[1], [0], [0], [1], [0, 0, 1, 1], [], []>} : vector<8x8xf32>, vector<8x8xf32>, vector<8x8xf32> -> vector<8x8xf32>
    %53 = tpu.concatenate %50, %52 in 0 : vector<8x8xf32>, vector<8x8xf32> -> vector<16x8xf32>
    %cst_43 = arith.constant 1.000000e+00 : f32
    %54 = vector.broadcast %cst_43 : f32 to vector<16x8xf32>
    %55 = arith.mulf %54, %47 : vector<16x8xf32>
    %56 = arith.addf %53, %55 : vector<16x8xf32>
    %57 = vector.broadcast %48 : vector<1x8xf32> to vector<16x8xf32>
    %58 = arith.addf %56, %57 : vector<16x8xf32>
    %c0_44 = arith.constant 0 : index
    %c0_45 = arith.constant 0 : index
    %59 = vector.load %arg14[%c0_44, %c0_45] : memref<4x8xf32, #tpu.memory_space<vmem>>, vector<4x8xf32>
    %c0_46 = arith.constant 0 : index
    %c0_47 = arith.constant 0 : index
    %60 = vector.load %arg15[%c0_46, %c0_47] : memref<16x8xf32, #tpu.memory_space<vmem>>, vector<16x8xf32>
    %cst_48 = arith.constant dense<0.000000e+00> : vector<16x8xf32>
    %61 = tpu.matmul %1, %59, %cst_48 {dimension_numbers = #tpu.dot_dimension_numbers<[1], [0], [0], [1], [0, 0, 1, 1], [], []>} : vector<16x4xf32>, vector<4x8xf32>, vector<16x8xf32> -> vector<16x8xf32>
    %cst_49 = arith.constant dense<0.000000e+00> : vector<16x8xf32>
    %62 = tpu.matmul %42, %60, %cst_49 {dimension_numbers = #tpu.dot_dimension_numbers<[1], [0], [0], [1], [0, 0, 1, 1], [], []>} : vector<16x16xf32>, vector<16x8xf32>, vector<16x8xf32> -> vector<16x8xf32>
    %63 = arith.addf %61, %62 : vector<16x8xf32>
    %c0_50 = arith.constant 0 : index
    %c0_51 = arith.constant 0 : index
    %64 = vector.load %arg16[%c0_50, %c0_51] : memref<1x8xf32, #tpu.memory_space<vmem>>, vector<1x8xf32>
    %65 = vector.extract_strided_slice %63 {offsets = [0, 0], sizes = [8, 8], strides = [1, 1]} : vector<16x8xf32> to vector<8x8xf32>
    %cst_52 = arith.constant dense<0.000000e+00> : vector<8x8xf32>
    %66 = tpu.matmul %0, %65, %cst_52 {dimension_numbers = #tpu.dot_dimension_numbers<[1], [0], [0], [1], [0, 0, 1, 1], [], []>} : vector<8x8xf32>, vector<8x8xf32>, vector<8x8xf32> -> vector<8x8xf32>
    %67 = vector.extract_strided_slice %63 {offsets = [8, 0], sizes = [8, 8], strides = [1, 1]} : vector<16x8xf32> to vector<8x8xf32>
    %cst_53 = arith.constant dense<0.000000e+00> : vector<8x8xf32>
    %68 = tpu.matmul %0, %67, %cst_53 {dimension_numbers = #tpu.dot_dimension_numbers<[1], [0], [0], [1], [0, 0, 1, 1], [], []>} : vector<8x8xf32>, vector<8x8xf32>, vector<8x8xf32> -> vector<8x8xf32>
    %69 = tpu.concatenate %66, %68 in 0 : vector<8x8xf32>, vector<8x8xf32> -> vector<16x8xf32>
    %cst_54 = arith.constant 1.000000e+00 : f32
    %70 = vector.broadcast %cst_54 : f32 to vector<16x8xf32>
    %71 = arith.mulf %70, %63 : vector<16x8xf32>
    %72 = arith.addf %69, %71 : vector<16x8xf32>
    %73 = vector.broadcast %64 : vector<1x8xf32> to vector<16x8xf32>
    %74 = arith.addf %72, %73 : vector<16x8xf32>
    %c0_55 = arith.constant 0 : index
    %c0_56 = arith.constant 0 : index
    %75 = vector.load %arg3[%c0_55, %c0_56] : memref<8x8xf32, #tpu.memory_space<vmem>>, vector<8x8xf32>
    %76 = vector.extract_strided_slice %74 {offsets = [8, 0], sizes = [8, 8], strides = [1, 1]} : vector<16x8xf32> to vector<8x8xf32>
    %cst_57 = arith.constant 5.000000e-01 : f32
    %77 = vector.broadcast %cst_57 : f32 to vector<8x8xf32>
    %78 = arith.mulf %76, %77 : vector<8x8xf32>
    %79 = math.exp %78 : vector<8x8xf32>
    %80 = arith.mulf %75, %79 : vector<8x8xf32>
    %81 = vector.extract_strided_slice %58 {offsets = [8, 0], sizes = [8, 8], strides = [1, 1]} : vector<16x8xf32> to vector<8x8xf32>
    %82 = arith.addf %80, %81 : vector<8x8xf32>
    %c0_58 = arith.constant 0 : index
    %c0_59 = arith.constant 0 : index
    %83 = vector.load %arg17[%c0_58, %c0_59] : memref<16x8xf32, #tpu.memory_space<vmem>>, vector<16x8xf32>
    tpu.vector_store %arg17[%c0_58, %c0_59], %58 {strides = array<i32>} : memref<16x8xf32, #tpu.memory_space<vmem>>, vector<16x8xf32>,
    %c0_60 = arith.constant 0 : index
    %c0_61 = arith.constant 0 : index
    %84 = vector.load %arg18[%c0_60, %c0_61] : memref<16x8xf32, #tpu.memory_space<vmem>>, vector<16x8xf32>
    tpu.vector_store %arg18[%c0_60, %c0_61], %74 {strides = array<i32>} : memref<16x8xf32, #tpu.memory_space<vmem>>, vector<16x8xf32>,
    %c0_62 = arith.constant 0 : index
    %c0_63 = arith.constant 0 : index
    %85 = vector.load %arg19[%c0_62, %c0_63] : memref<8x8xf32, #tpu.memory_space<vmem>>, vector<8x8xf32>
    tpu.vector_store %arg19[%c0_62, %c0_63], %82 {strides = array<i32>} : memref<8x8xf32, #tpu.memory_space<vmem>>, vector<8x8xf32>,
    return
  }
}

</mosaic_0001>

<bundles_post_ra>
// kernel: sig_encoder_apply.1
= control target key start
LH: loop header
LB: loop body
LE: loop exit
PB: predicated region body
PF: predicated region fallthrough
CT: control target
= control target key end

     0   :  { %s1988_s0 = inlined_call_operand.vmem [shape: f32[8,8], index: 0, kind: input, shape index: {}]   ;;  %s1989_s1 = inlined_call_operand.vmem [shape: f32[16,4], index: 1, kind: input, shape index: {}]   ;;  %s1990_s2 = inlined_call_operand.vmem [shape: f32[2,16,8], index: 2, kind: input, shape index: {}]   ;;  %s1991_s3 = inlined_call_operand.vmem [shape: f32[8,8], index: 3, kind: input, shape index: {}]   ;;  %s1992_s4 = inlined_call_operand.vmem [shape: f32[4,16], index: 4, kind: input, shape index: {}]   ;;  %s1993_s5 = inlined_call_operand.vmem [shape: f32[8,16], index: 5, kind: input, shape index: {}]   ;;  %s1994_s6 = inlined_call_operand.vmem [shape: f32[1,16], index: 6, kind: input, shape index: {}]   ;;  %s1995_s7 = inlined_call_operand.vmem [shape: f32[4,16], index: 7, kind: input, shape index: {}]   ;;  %s1996_s8 = inlined_call_operand.vmem [shape: f32[8,16], index: 8, kind: input, shape index: {}]   ;;  %s1997_s9 = inlined_call_operand.vmem [shape: f32[16,16], index: 9, kind: input, shape index: {}]   ;;  %s1998_s10 = inlined_call_operand.vmem [shape: f32[1,16], index: 10, kind: input, shape index: {}]   ;;  %s1999_s11 = inlined_call_operand.vmem [shape: f32[4,8], index: 11, kind: input, shape index: {}]   ;;  %s2000_s12 = inlined_call_operand.vmem [shape: f32[16,8], index: 12, kind: input, shape index: {}]   ;;  %s2001_s13 = inlined_call_operand.vmem [shape: f32[1,8], index: 13, kind: input, shape index: {}]   ;;  %s2002_s14 = inlined_call_operand.vmem [shape: f32[4,8], index: 14, kind: input, shape index: {}]   ;;  %s2003_s15 = inlined_call_operand.vmem [shape: f32[16,8], index: 15, kind: input, shape index: {}]   ;;  %s2004_s16 = inlined_call_operand.vmem [shape: f32[1,8], index: 16, kind: input, shape index: {}]   ;;  %s2005_s17 = inlined_call_operand.hbm [shape: f32[16,8], index: 17, kind: output, shape index: {0}]   ;;  %s2006_s18 = inlined_call_operand.hbm [shape: f32[16,8], index: 18, kind: output, shape index: {1}]   ;;  %s2007_s19 = inlined_call_operand.hbm [shape: f32[8,8], index: 19, kind: output, shape index: {2}]  }
   0x1   :  { %2010 = sst [smem:[#allocation9_spill]] %s1988_s0 }
   0x2   :  { %2011 = sst [smem:[#allocation10_spill]] %s1989_s1 }
   0x3   :  { %2012 = sst [smem:[#allocation11_spill]] %s1990_s2 }
   0x4   :  { %2013 = sst [smem:[#allocation12_spill]] %s1991_s3 }
   0x5   :  { %25 = vsyncpa [#allocation3], 0  ;;  %v65_v0 = vld [vmem:[%s1993_s5] sm:$0xff]  ;;  %vm157_vm0 = vcmask 1043456   ;;  %s2014_s2 = sld [smem:[#allocation11_spill]]  ;;  %vm68_vm1 = vcmask 64512  }
   0x6   :  { %v64_v1 = vld [vmem:[%s1992_s4] sm:$0xf]  ;;  %1551 = vmatprep.subr.mxu0 %v65_v0  ;;  %s2015_s25 = sld [smem:[#allocation10_spill]]  ;;  %vm150_vm2 = vcmask 31744  }
   0x7   :  { %1556 = vmatprep.subr.msk.mxu1 %vm157_vm0, %v64_v1  ;;  %1552 = vmatpush3.msra.mxu0 %v65_v0 }
   0xb   :  { %v66_v2 = vld [vmem:[%s2014_s2] sm:$0xff]  ;;  %v67_v4 = vld [vmem:[%s2014_s2 + $0x8] sm:$0xff] }
   0xc   :  { %v1835_v3 = vld [vmem:[%s2015_s25] sm:$0xff]  ;;  %v1843_v5 = vld [vmem:[%s2015_s25 + $0x8] sm:$0xff]  ;;  %1553 = vmatprep.mubr.msk.f32.mxu0 %vm68_vm1, %v66_v2 }
   0xd   :  { %26 = vsyncpa [#allocation5], 0  ;;  %1557 = vmatpush3.msk.msra.mxu1 %vm157_vm0, %v64_v1  ;;  %1558 = vmatprep.mubr.msk.f32.mxu1 %vm150_vm2, %v1835_v3  ;;  %v1715_v6 = vmov 0.0   ;;  %vm1716_vm3 = vmmov 0   ;;  %s2016_s29 = sld [smem:[#allocation9_spill]]  ;;  %v391_v14 = vld [vmem:[%s1996_s8] sm:$0xff] }
   0xe   :  { %1554 = vmatmul.mubr.msk.f32.vlgmr.msra.gmra.mxu0 %vm68_vm1, %v67_v4  ;;  %1559 = vmatmul.mubr.msk.f32.vlgmr.msra.gmra.mxu1 %vm150_vm2, %v1843_v5  ;;  %v390_v15 = vld [vmem:[%s1995_s7] sm:$0xf]  ;;  %v1477_v16 = vld [vmem:[%s2014_s2 + $0x10] sm:$0xff]  ;;  %v1478_v17 = vld [vmem:[%s2014_s2 + $0x18] sm:$0xff]  ;;  %vm556_vm4 = vcmask 130048  }
   0xf   :  { %1566 = vmatprep.subr.mxu1 %v1715_v6  ;;  %1561 = vmatprep.subr.mxu0 %v1715_v6  ;;  %v555_v18 = vld [vmem:[%s1997_s9 + $0x8] sm:$0xff]  ;;  %v554_v19 = vld [vmem:[%s1997_s9] sm:$0xff] }
  0x10   :  { %1568 = vmatprep.mubr.msk.f32.mxu1 %vm1716_vm3, %v1715_v6  ;;  %1563 = vmatprep.mubr.msk.f32.mxu0 %vm1716_vm3, %v1715_v6  ;;  %v1476_v24 = vld [vmem:[%s1994_s6] ss:$0 sm:$0xff]  ;;  %v795_v39 = vld [vmem:[%s2000_s12 + $0x8] sm:$0xff] }
  0x11   :  { %v793_v40 = vld [vmem:[%s1999_s11] sm:$0xf]  ;;  %v1108_v60 = vld [vmem:[%s2003_s15 + $0x8] sm:$0xff] }
  0x12   :  { %v794_v41 = vld [vmem:[%s2000_s12] sm:$0xff] }
  0x13   :  { %v1861_v10 = vld [vmem:[%s2016_s29] sm:$0xff] }
  0x14   :  { %v1488_v43 = vld [vmem:[%s1998_s10] ss:$0 sm:$0xff] }
  0x15   :  { %v1106_v56 = vld [vmem:[%s2002_s14] sm:$0xf] }
  0x16   :  { %v1107_v61 = vld [vmem:[%s2003_s15] sm:$0xff] }
  0x17   :  { %v1496_v62 = vld [vmem:[%s2001_s13] ss:$0 sm:$0xff]  ;;  %s1717_s13 = smov [#allocation2]  }
  0x18   :  { %s1429_s1 = sshll.u32 %s1717_s13, 4  ;;  %s1430_s1 = int_to_ptr.vmem [resolvable:$true] %s1429_s1 }
  0x19   :  { %s1651_s22 = scalar_lea.vmem %s1430_s1, 256  ;;  %p1656_p1 = scmp.lt.s32.totalorder %s1430_s1, %s1430_s1 }
  0x1a   :  { %p1652_p0 = scmp.ne.s32.totalorder %s1430_s1, %s1651_s22  ;;  %p1657_p2 = scmp.lt.s32.totalorder %s1651_s22, %s1651_s22 }
  0x1c   :  { %p1658_p3 = por %p1657_p2, %p1656_p1 }
  0x1e   :  { %p1659_p4 = pnand %p1658_p3, %p1652_p0 }
  0xce   :  { %v1555_v7 = vpop.f32.mrf.mxu0  ;;  %v1560_v8 = vpop.f32.mrf.mxu1 }
  0xcf   :  { %v233_v9 = vadd.f32 %v1560_v8, %v1555_v7 }
  0xd0   :  { %v141_v11 = vpop.f32.mrf.mxu0  ;;  %v227_v12 = vpop.f32.mrf.mxu1 }
  0xd1   :  { %v228_v13 = vadd.f32 %v227_v12, %v141_v11  ;;  %1567 = vmatpush3.msra.mxu1 %v233_v9 }
  0xd2   :  { %1569 = vmatmul.mubr.msk.f32.vlgmr.msra.gmra.mxu1 %vm68_vm1, %v1861_v10  ;;  %1576 = vmatprep.subr.msk.mxu1 %vm157_vm0, %v390_v15 }
  0xd3   :  { %1562 = vmatpush3.msra.mxu0 %v228_v13  ;;  %1578 = vmatprep.mubr.msk.f32.mxu1 %vm150_vm2, %v1835_v3 }
  0xd4   :  { %1564 = vmatmul.mubr.msk.f32.vlgmr.msra.gmra.mxu0 %vm68_vm1, %v1861_v10  ;;  %1571 = vmatprep.subr.mxu0 %v391_v14 }
  0xd5   :  { %1572 = vmatpush3.msra.mxu0 %v391_v14  ;;  %1573 = vmatprep.mubr.msk.f32.mxu0 %vm68_vm1, %v1477_v16 }
  0xd6   :  { %1577 = vmatpush3.msk.msra.mxu1 %vm157_vm0, %v390_v15  ;;  %1581 = vmatprep.subr.mxu0 %v555_v18 }
  0xd7   :  { %1579 = vmatmul.mubr.msk.f32.vlgmr.msra.gmra.mxu1 %vm150_vm2, %v1843_v5  ;;  %1588 = vmatprep.subr.mxu1 %v1715_v6 }
  0xd8   :  { %1574 = vmatmul.mubr.msk.f32.vlgmr.msra.gmra.mxu0 %vm68_vm1, %v1478_v17  ;;  %1590 = vmatprep.mubr.msk.f32.mxu1 %vm1716_vm3, %v1715_v6 }
  0xd9   :  { %1582 = vmatpush3.msra.mxu0 %v555_v18 }
  0xda   :  { %1583 = vmatprep.subr.mxu0 %v554_v19 }
  0xdb   :  { %1584 = vmatpush3.msra.mxu0 %v554_v19 }
  0xdc   :  { %1593 = vmatprep.subr.mxu0 %v1715_v6 }
 0x192   :  { %v376_v20 = vpop.f32.mrf.mxu1 }
 0x193   :  { %v381_v21 = vadd.f32 %v376_v20, %v233_v9 }
 0x194   :  { %v306_v22 = vpop.f32.mrf.mxu0  ;;  %v1570_v23 = vpop.f32.mrf.mxu1 }
 0x195   :  { %v380_v25 = vadd.f32 %v306_v22, %v228_v13  ;;  %v389_v28 = vadd.f32 %v1476_v24, %v381_v21 }
 0x196   :  { %v1565_v26 = vpop.f32.mrf.mxu0 }
 0x197   :  { %v388_v27 = vadd.f32 %v1476_v24, %v380_v25  ;;  %v1580_v30 = vpop.f32.mrf.mxu1 }
 0x198   :  { %v1575_v29 = vpop.f32.mrf.mxu0 }
 0x199   :  { %1585 = vmatprep.mubr.msk.f32.mxu0 %vm556_vm4, %v388_v27  ;;  %v545_v32 = vpop.f32.mrf.mxu1  ;;  %v551_v33 = vadd.f32 %v1580_v30, %v1575_v29 }
 0x19a   :  { %1586 = vmatmul.mubr.msk.f32.vlgmr.msra.gmra.mxu0 %vm556_vm4, %v389_v28  ;;  %v467_v31 = vpop.f32.mrf.mxu0 }
 0x19b   :  { %1595 = vmatprep.mubr.msk.f32.mxu0 %vm1716_vm3, %v1715_v6  ;;  %v546_v35 = vadd.f32 %v545_v32, %v467_v31 }
 0x25a   :  { %v1587_v34 = vpop.f32.mrf.mxu0 }
 0x25b   :  { %v639_v36 = vadd.f32 %v1587_v34, %v551_v33 }
 0x25c   :  { %v629_v37 = vpop.f32.mrf.mxu0 }
 0x25d   :  { %v638_v38 = vadd.f32 %v629_v37, %v546_v35  ;;  %1594 = vmatpush3.msra.mxu0 %v639_v36 }
 0x25e   :  { %1596 = vmatmul.mubr.msk.f32.vlgmr.msra.gmra.mxu0 %vm68_vm1, %v1861_v10  ;;  %1605 = vmatprep.subr.msk.mxu0 %vm157_vm0, %v793_v40 }
 0x25f   :  { %1589 = vmatpush3.msra.mxu1 %v638_v38  ;;  %1607 = vmatprep.mubr.msk.f32.mxu0 %vm150_vm2, %v1835_v3 }
 0x260   :  { %1591 = vmatmul.mubr.msk.f32.vlgmr.msra.gmra.mxu1 %vm68_vm1, %v1861_v10  ;;  %1598 = vmatprep.subr.mxu1 %v795_v39 }
 0x261   :  { %1599 = vmatpush3.msra.mxu1 %v795_v39  ;;  %1606 = vmatpush3.msk.msra.mxu0 %vm157_vm0, %v793_v40 }
 0x262   :  { %1600 = vmatprep.subr.mxu1 %v794_v41  ;;  %1608 = vmatmul.mubr.msk.f32.vlgmr.msra.gmra.mxu0 %vm150_vm2, %v1843_v5 }
 0x263   :  { %1601 = vmatpush3.msra.mxu1 %v794_v41  ;;  %1615 = vmatprep.subr.mxu0 %v1715_v6 }
 0x264   :  { %1617 = vmatprep.mubr.msk.f32.mxu0 %vm1716_vm3, %v1715_v6  ;;  %1610 = vmatprep.subr.mxu1 %v1715_v6 }
 0x31e   :  { %v777_v42 = vpop.f32.mrf.mxu0 }
 0x31f   :  { %v782_v44 = vadd.f32 %v777_v42, %v639_v36 }
 0x320   :  { %v707_v45 = vpop.f32.mrf.mxu1  ;;  %v1597_v46 = vpop.f32.mrf.mxu0 }
 0x321   :  { %v781_v47 = vadd.f32 %v707_v45, %v638_v38  ;;  %v790_v48 = vadd.f32 %v1488_v43, %v782_v44 }
 0x322   :  { %v1592_v49 = vpop.f32.mrf.mxu1  ;;  %v1609_v53 = vpop.f32.mrf.mxu0 }
 0x323   :  { %v789_v50 = vadd.f32 %v1488_v43, %v781_v47  ;;  %v792_v52 = vmax.f32 %v790_v48, 0.0 }
 0x324   :  { %v946_v57 = vpop.f32.mrf.mxu0 }
 0x325   :  { %v791_v51 = vmax.f32 %v789_v50, 0.0 }
 0x327   :  { %1602 = vmatprep.mubr.msk.f32.mxu1 %vm556_vm4, %v791_v51 }
 0x328   :  { %1603 = vmatmul.mubr.msk.f32.vlgmr.msra.gmra.mxu1 %vm556_vm4, %v792_v52 }
 0x329   :  { %1612 = vmatprep.mubr.msk.f32.mxu1 %vm1716_vm3, %v1715_v6 }
 0x3e8   :  { %v1604_v54 = vpop.f32.mrf.mxu1 }
 0x3e9   :  { %v952_v55 = vadd.f32 %v1609_v53, %v1604_v54 }
 0x3ea   :  { %v868_v58 = vpop.f32.mrf.mxu1 }
 0x3eb   :  { %v947_v59 = vadd.f32 %v946_v57, %v868_v58  ;;  %1616 = vmatpush3.msra.mxu0 %v952_v55 }
 0x3ec   :  { %1618 = vmatmul.mubr.msk.f32.vlgmr.msra.gmra.mxu0 %vm68_vm1, %v1861_v10  ;;  %1627 = vmatprep.subr.msk.mxu0 %vm157_vm0, %v1106_v56 }
 0x3ed   :  { %1611 = vmatpush3.msra.mxu1 %v947_v59  ;;  %1628 = vmatpush3.msk.msra.mxu0 %vm157_vm0, %v1106_v56 }
 0x3ee   :  { %1613 = vmatmul.mubr.msk.f32.vlgmr.msra.gmra.mxu1 %vm68_vm1, %v1861_v10  ;;  %1620 = vmatprep.subr.mxu1 %v1108_v60 }
 0x3ef   :  { %1621 = vmatpush3.msra.mxu1 %v1108_v60  ;;  %1624 = vmatprep.mubr.msk.f32.mxu1 %vm556_vm4, %v791_v51 }
 0x3f0   :  { %1629 = vmatprep.mubr.msk.f32.mxu0 %vm150_vm2, %v1835_v3  ;;  %1622 = vmatprep.subr.mxu1 %v1107_v61 }
 0x3f1   :  { %1630 = vmatmul.mubr.msk.f32.vlgmr.msra.gmra.mxu0 %vm150_vm2, %v1843_v5  ;;  %1623 = vmatpush3.msra.mxu1 %v1107_v61 }
 0x3f2   :  { %1625 = vmatmul.mubr.msk.f32.vlgmr.msra.gmra.mxu1 %vm556_vm4, %v792_v52  ;;  %1637 = vmatprep.subr.mxu0 %v1715_v6 }
 0x3f3   :  { %1639 = vmatprep.mubr.msk.f32.mxu0 %vm1716_vm3, %v1715_v6  ;;  %1632 = vmatprep.subr.mxu1 %v1715_v6 }
 0x3f4   :  { %1634 = vmatprep.mubr.msk.f32.mxu1 %vm1716_vm3, %v1715_v6 }
 0x4ac   :  { %v1092_v63 = vpop.f32.mrf.mxu0 }
 0x4ad   :  { %v1097_v0 = vadd.f32 %v1092_v63, %v952_v55 }
 0x4ae   :  { %v1022_v1 = vpop.f32.mrf.mxu1  ;;  %v1619_v2 = vpop.f32.mrf.mxu0 }
 0x4af   :  { %v1105_v3 = vadd.f32 %v1496_v62, %v1097_v0  ;;  %v1096_v4 = vadd.f32 %v1022_v1, %v947_v59 }
 0x4b0   :  { %v1614_v5 = vpop.f32.mrf.mxu1 }
 0x4b1   :  { %1420 = vst.msk [vmem:[#allocation2 + $0x8] sm:$0xff] %vm68_vm1, %v1105_v3  ;;  %v1104_v7 = vadd.f32 %v1496_v62, %v1096_v4  ;;  %v1631_v8 = vpop.f32.mrf.mxu0 }
 0x4b2   :  { %v1626_v9 = vpop.f32.mrf.mxu1 }
 0x4b3   :  { %1419 = vst.msk [vmem:[#allocation2] sm:$0xff] %vm68_vm1, %v1104_v7  ;;  %v1259_v11 = vadd.f32 %v1631_v8, %v1626_v9  ;;  %v1253_v6 = vpop.f32.mrf.mxu0 }
 0x4b4   :  { %v1175_v12 = vpop.f32.mrf.mxu1 }
 0x4b5   :  { %v1254_v13 = vadd.f32 %v1253_v6, %v1175_v12  ;;  %1638 = vmatpush3.msra.mxu0 %v1259_v11 }
 0x4b6   :  { %1640 = vmatmul.mubr.msk.f32.vlgmr.msra.gmra.mxu0 %vm68_vm1, %v1861_v10 }
 0x4b7   :  { %1633 = vmatpush3.msra.mxu1 %v1254_v13 }
 0x4b8   :  { %1635 = vmatmul.mubr.msk.f32.vlgmr.msra.gmra.mxu1 %vm68_vm1, %v1861_v10 }
 0x4b9   :  { %1662 = shalt.err (!%p1659_p4)
}
 0x4ba   :  { %s1718_s23 = smov 128   ;;  %s1719_s24 = smov 8   ;;  %v1504_v10 = vld [vmem:[%s2004_s16] ss:$0 sm:$0xff] }
 0x4bb   :  { %1435 = dma.vmem_to_hbm [thread:$0]  %s1430_s1, 256, %s2005_s17, [#allocation3], %s1718_s23, %s1718_s23, %s1719_s24  }
 0x4bc   :  { %s1720_s5 = smov [#allocation4]  }
 0x4bd   :  { %s1441_s3 = sshll.u32 %s1720_s5, 4  ;;  %s1442_s3 = int_to_ptr.vmem [resolvable:$true] %s1441_s3 }
 0x4be   :  { %s1671_s17 = scalar_lea.vmem %s1442_s3, 256  ;;  %p1676_p6 = scmp.lt.s32.totalorder %s1442_s3, %s1442_s3 }
 0x4bf   :  { %p1672_p5 = scmp.ne.s32.totalorder %s1442_s3, %s1671_s17  ;;  %p1677_p7 = scmp.lt.s32.totalorder %s1671_s17, %s1671_s17 }
 0x4c1   :  { %p1678_p8 = por %p1677_p7, %p1676_p6 }
 0x4c3   :  { %p1679_p9 = pnand %p1678_p8, %p1672_p5 }
 0x576   :  { %v1399_v14 = vpop.f32.mrf.mxu0 }
 0x577   :  { %v1404_v15 = vadd.f32 %v1399_v14, %v1259_v11 }
 0x578   :  { %v1329_v16 = vpop.f32.mrf.mxu1  ;;  %v1641_v17 = vpop.f32.mrf.mxu0 }
 0x579   :  { %v1412_v18 = vadd.f32 %v1504_v10, %v1404_v15  ;;  %v1403_v19 = vadd.f32 %v1329_v16, %v1254_v13 }
 0x57a   :  { %v1636_v20 = vpop.f32.mrf.mxu1 }
 0x57b   :  { %v1414_v21 = vmul.f32 0.5, %v1412_v18  ;;  %1422 = vst.msk [vmem:[#allocation4 + $0x8] sm:$0xff] %vm68_vm1, %v1412_v18  ;;  %v1411_v22 = vadd.f32 %v1504_v10, %v1403_v19 }
 0x57d   :  { %v1415_v23 = vmul.f32 1.442695, %v1414_v21  ;;  %1421 = vst.msk [vmem:[#allocation4] sm:$0xff] %vm68_vm1, %v1411_v22 }
 0x57e   :  { %1682 = shalt.err (!%p1679_p9)
}
 0x57f   :  { %1447 = dma.vmem_to_hbm [thread:$0]  %s1442_s3, 256, %s2006_s18, [#allocation5], %s1718_s23, %s1718_s23, %s1719_s24   ;;  %1649 = vpow2.f32 %v1415_v23 }
 0x580   :  { %s2017_s26 = sld [smem:[#allocation12_spill]]  ;;  %s1721_s27 = smov [#allocation6]  }
 0x581   :  { %s1454_s28 = sshll.u32 %s1721_s27, 4  ;;  %s1455_s28 = int_to_ptr.vmem [resolvable:$true] %s1454_s28 }
 0x582   :  { %s1691_s11 = scalar_lea.vmem %s1455_s28, 128  ;;  %p1696_p11 = scmp.lt.s32.totalorder %s1455_s28, %s1455_s28 }
 0x583   :  { %p1692_p10 = scmp.ne.s32.totalorder %s1455_s28, %s1691_s11  ;;  %p1697_p12 = scmp.lt.s32.totalorder %s1691_s11, %s1691_s11 }
 0x585   :  { %p1698_p13 = por %p1697_p12, %p1696_p11 }
 0x586   :  { %v1413_v24 = vld [vmem:[%s2017_s26] sm:$0xff] }
 0x587   :  { %p1699_p0 = pnand %p1698_p13, %p1692_p10 }
 0x58c   :  { %v1650_v25 = vpop.eup %1649 }
 0x58d   :  { %v1417_v26 = vmul.f32 %v1650_v25, %v1413_v24 }
 0x58f   :  { %v1418_v27 = vadd.f32 %v1417_v26, %v1105_v3 }
 0x591   :  { %1423 = vst.msk [vmem:[#allocation6] sm:$0xff] %vm68_vm1, %v1418_v27 }
 0x592   :  { %1702 = shalt.err (!%p1699_p0)
}
 0x593   :  { %1457 = dma.vmem_to_hbm [thread:$0]  %s1455_s28, 128, %s2007_s19, [#allocation5]  }
 0x594   :  { %1711 = dma.done.wait [#allocation3], 256  }
 0x595   :  { %1712 = vsyncadd [#allocation3], 4294967040 }
 0x596   :  { %1713 = dma.done.wait [#allocation5], 384  }
 0x597   :  { %1714 = vsyncadd [#allocation5], 4294966912 }
 0x598   :  { %1467 = vsyncpa [#allocation3], 1 }
 0x599   :  { %1468 = vsyncpa [#allocation5], 1 }

</bundles_post_ra>
